<compile_context>
chip_gen: v7x
topology: tpu7x:2x2x1
jax: 0.10.0
libtpu: 0.0.40
codegen_flags: <defaults>
</compile_context>

<pallas_src>
import functools

import jax
import jax.numpy as jnp
from jax.experimental import pallas as pl
from jax.experimental.pallas import tpu as pltpu


def _round_up(x, m):
    return (x + m - 1) // m * m


# ----------------------------------------------------------------------------
# Embedding row gather:  out[i, :] = table[ids[i], :]
# ids are scalar-prefetched into SMEM and drive the table BlockSpec index_map.
# ----------------------------------------------------------------------------
def _embed_gather_kernel(ids_ref, table_ref, out_ref):
    del ids_ref  # only used by the index_maps
    out_ref[...] = table_ref[...]


def embedding_gather(ids, table):
    """ids: (N,) int32, table: (V, E) f32  ->  (N, E) f32 (exact gather)."""
    n = int(ids.shape[0])
    V, E = table.shape
    table3 = table.reshape(V, 1, E)   # (1, E) trailing block == full dims
    out = pl.pallas_call(
        _embed_gather_kernel,
        out_shape=jax.ShapeDtypeStruct((n, 1, E), table.dtype),
        grid_spec=pltpu.PrefetchScalarGridSpec(
            num_scalar_prefetch=1,
            grid=(n,),
            in_specs=[pl.BlockSpec((1, 1, E), lambda i, ids: (ids[i], 0, 0))],
            out_specs=pl.BlockSpec((1, 1, E), lambda i, ids: (i, 0, 0)),
        ),
        compiler_params=pltpu.CompilerParams(
            dimension_semantics=("arbitrary",)),
    )(ids.astype(jnp.int32), table3)
    return out.reshape(n, E)


# ----------------------------------------------------------------------------
# Fused GEMM + bias kernel:  out = a(f32, cast to bf16 in-kernel) @ w(bf16) + b
# Accumulator is initialized with the broadcast bias (no epilogue add pass).
# ----------------------------------------------------------------------------
def _fused_matmul_kernel(a_ref, w_ref, b_ref, o_ref, acc_ref):
    @pl.when(pl.program_id(2) == 0)
    def _():
        acc_ref[...] = jnp.broadcast_to(b_ref[...], acc_ref.shape)

    acc_ref[...] += jnp.dot(a_ref[...].astype(jnp.bfloat16), w_ref[...],
                            preferred_element_type=jnp.float32)

    @pl.when(pl.program_id(2) == pl.num_programs(2) - 1)
    def _():
        o_ref[...] = acc_ref[...].astype(o_ref.dtype)


def fused_matmul(a, w, bias2d, *, tm=256, tk_max=1024):
    """out[M, N] = a[M, K] @ w[K, N] + bias.

    a: f32 activations.  w: bf16, pre-padded at init time (N % 128 == 0).
    bias2d: (1, N) f32.  f32 accumulation, f32 output.
    """
    M, K = a.shape
    K2, N = w.shape
    assert K == K2 and bias2d.shape == (1, N) and N % 128 == 0

    # M tiling (activation rows).  Round small M to 16 (bf16 sublane packing).
    if M <= tm:
        TM = _round_up(M, 16)
        Mp = TM
    else:
        TM, Mp = tm, _round_up(M, tm)

    # N tiling: weights are pre-padded to a multiple of 128.
    TN = 512 if (N >= 512 and N % 512 == 0) else (256 if N % 256 == 0 else 128)

    # K tiling: take the whole reduction when it fits, else 128-aligned tiles.
    if K <= tk_max:
        TK, Kp = K, K
    else:
        TK = next((c for c in (1024, 512, 256, 128) if K % c == 0), 128)
        Kp = _round_up(K, TK)

    # Keep >=2 parallel tiles when possible so both v7x TensorCores get work.
    if Mp // TM == 1 and N // TN == 1 and N > 128:
        m_lanes = N // 128
        d = max(x for x in range(1, m_lanes) if m_lanes % x == 0)
        TN = 128 * d

    if Mp != M or Kp != K:
        a = jnp.pad(a, ((0, Mp - M), (0, Kp - K)))
    if Kp != K:
        w = jnp.pad(w, ((0, Kp - K), (0, 0)))

    out = pl.pallas_call(
        _fused_matmul_kernel,
        out_shape=jax.ShapeDtypeStruct((Mp, N), jnp.float32),
        grid=(Mp // TM, N // TN, Kp // TK),
        in_specs=[
            pl.BlockSpec((TM, TK), lambda i, j, k: (i, k)),
            pl.BlockSpec((TK, TN), lambda i, j, k: (k, j)),
            pl.BlockSpec((1, TN), lambda i, j, k: (0, j)),
        ],
        out_specs=pl.BlockSpec((TM, TN), lambda i, j, k: (i, j)),
        scratch_shapes=[pltpu.VMEM((TM, TN), jnp.float32)],
        compiler_params=pltpu.CompilerParams(
            dimension_semantics=("parallel", "parallel", "arbitrary")),
    )(a, w, bias2d)
    return out[:M] if Mp != M else out


# ----------------------------------------------------------------------------
# Sequential LSTM recurrence (input projection precomputed outside).
# Processes U timesteps per grid step; h/c stay resident in VMEM scratch.
# Gate column order matches PyTorch: [ i | f | g | o ].
# ----------------------------------------------------------------------------
def _lstm_kernel(gx_ref, whh_ref, out_ref, h_ref, c_ref, *, hidden, steps):
    @pl.when(pl.program_id(0) == 0)
    def _():
        h_ref[...] = jnp.zeros_like(h_ref)   # PyTorch default zero (h0, c0)
        c_ref[...] = jnp.zeros_like(c_ref)

    def step(u, carry):
        # bf16 MXU operands, f32 accumulation; gate math stays f32 (v5e-safe).
        gates = gx_ref[u] + jnp.dot(h_ref[...].astype(jnp.bfloat16),
                                    whh_ref[...],
                                    preferred_element_type=jnp.float32)
        i_g = jax.nn.sigmoid(gates[:, 0 * hidden:1 * hidden])
        f_g = jax.nn.sigmoid(gates[:, 1 * hidden:2 * hidden])
        g_g = jnp.tanh(gates[:, 2 * hidden:3 * hidden])
        o_g = jax.nn.sigmoid(gates[:, 3 * hidden:4 * hidden])
        c_new = f_g * c_ref[...] + i_g * g_g
        h_new = o_g * jnp.tanh(c_new)
        c_ref[...] = c_new
        h_ref[...] = h_new
        out_ref[u] = h_new.astype(out_ref.dtype)
        return carry

    jax.lax.fori_loop(0, steps, step, 0, unroll=True)


def lstm_recurrence(gx, w_hh_bf16, hidden_p, *, max_unroll=8):
    """gx: (T, Bp, 4*Hp) f32 = x_t @ W_ih + (b_ih + b_hh).
    w_hh_bf16: (Hp, 4*Hp) bf16.  Returns stacked h_t: (T, Bp, Hp) f32."""
    T, Bp, G = gx.shape
    assert G == 4 * hidden_p and w_hh_bf16.shape == (hidden_p, G)

    U = 1
    for cand in (max_unroll, 4, 2):
        if T % cand == 0:
            U = cand
            break

    return pl.pallas_call(
        functools.partial(_lstm_kernel, hidden=hidden_p, steps=U),
        out_shape=jax.ShapeDtypeStruct((T, Bp, hidden_p), jnp.float32),
        grid=(T // U,),
        in_specs=[
            pl.BlockSpec((U, Bp, G), lambda t: (t, 0, 0)),
            pl.BlockSpec((hidden_p, G), lambda t: (0, 0)),
        ],
        out_specs=pl.BlockSpec((U, Bp, hidden_p), lambda t: (t, 0, 0)),
        scratch_shapes=[pltpu.VMEM((Bp, hidden_p), jnp.float32),   # h state
                        pltpu.VMEM((Bp, hidden_p), jnp.float32)],  # c state
        compiler_params=pltpu.CompilerParams(
            dimension_semantics=("arbitrary",)),  # true sequential recurrence
    )(gx, w_hh_bf16)


# ----------------------------------------------------------------------------
# Parameters: raw (PyTorch-shaped, weights pre-transposed to (in, out)) and a
# one-time "prepare" step that pads/casts everything for the kernels.
# ----------------------------------------------------------------------------
def init_decoder_params(key, embed_size, hidden_size, vocab_size):
    ks = jax.random.split(key, 7)
    bound = float(1.0 / (hidden_size ** 0.5))
    return {
        "embed_w": jax.random.normal(ks[0], (vocab_size, embed_size), jnp.float32),
        "w_ih": jax.random.uniform(ks[1], (embed_size, 4 * hidden_size), jnp.float32, -bound, bound),
        "w_hh": jax.random.uniform(ks[2], (hidden_size, 4 * hidden_size), jnp.float32, -bound, bound),
        "b_ih": jax.random.uniform(ks[3], (4 * hidden_size,), jnp.float32, -bound, bound),
        "b_hh": jax.random.uniform(ks[4], (4 * hidden_size,), jnp.float32, -bound, bound),
        "lin_w": jax.random.uniform(ks[5], (hidden_size, vocab_size), jnp.float32, -bound, bound),
        "lin_b": jax.random.uniform(ks[6], (vocab_size,), jnp.float32, -bound, bound),
    }


def _pad_gate_cols(x, H, Hp):
    """Pad the trailing 4*H (gate-major [i|f|g|o]) dim to 4*Hp per gate."""
    if Hp == H:
        return x
    lead = x.shape[:-1]
    x4 = x.reshape(lead + (4, H))
    pad = [(0, 0)] * len(lead) + [(0, 0), (0, Hp - H)]
    return jnp.pad(x4, pad).reshape(lead + (4 * Hp,))


def prepare_decoder_params(raw, embed_size, hidden_size, vocab_size):
    """One-time padding + bf16 cast (hoisted out of the per-call path).

    Padding is exact: padded weight/bias columns are zero, so padded hidden
    units stay exactly zero through the recurrence and the vocab Linear.
    """
    H, V = hidden_size, vocab_size
    Hp = _round_up(H, 128)          # gate slices on lane boundaries
    Vp = _round_up(V, 128)          # lane-dense logits tiles

    w_ih = _pad_gate_cols(raw["w_ih"], H, Hp).astype(jnp.bfloat16)           # (E, 4Hp)
    w_hh = _pad_gate_cols(raw["w_hh"], H, Hp)                                 # (H, 4Hp)
    w_hh = jnp.pad(w_hh, ((0, Hp - H), (0, 0))).astype(jnp.bfloat16)          # (Hp, 4Hp)  bf16-resident (v7x VMEM)
    b_gates = _pad_gate_cols(raw["b_ih"] + raw["b_hh"], H, Hp)
    b_gates = b_gates.reshape(1, 4 * Hp).astype(jnp.float32)
    lin_w = jnp.pad(raw["lin_w"], ((0, Hp - H), (0, Vp - V))).astype(jnp.bfloat16)
    lin_b = jnp.pad(raw["lin_b"], (0, Vp - V)).reshape(1, Vp).astype(jnp.float32)

    return {
        "embed_w": raw["embed_w"].astype(jnp.float32),   # exact f32 gather table
        "w_ih": w_ih, "w_hh": w_hh, "b_gates": b_gates,
        "lin_w": lin_w, "lin_b": lin_b,
        "E": embed_size, "H": H, "Hp": Hp, "V": V, "Vp": Vp,
    }


# ----------------------------------------------------------------------------
# Forward pass (matches DecoderRNN.forward)
# ----------------------------------------------------------------------------
def decoder_rnn_forward(params, features, captions):
    B, Tc = captions.shape
    E = params["E"]
    H, Hp = params["H"], params["Hp"]
    V = params["V"]
    T = Tc                       # (Tc - 1) caption tokens + 1 feature step
    Bp = max(8, _round_up(B, 8))  # sublane-aligned batch

    # self.embed(captions[:, :-1]) -- exact row gather, built time-major so no
    # big activation transpose is needed later.  Batch padding is done on the
    # tiny int32 ids (pad id 0; those rows are discarded at the end).
    ids = captions[:, :-1].astype(jnp.int32).T           # (Tc-1, B) time-major
    if Bp != B:
        ids = jnp.pad(ids, ((0, 0), (0, Bp - B)))
    cap_emb = embedding_gather(ids.reshape(-1), params["embed_w"])
    cap_emb = cap_emb.reshape(Tc - 1, Bp, E)

    # torch.cat((features.unsqueeze(1), cap_embedding), 1), time-major.
    feat = features.astype(jnp.float32)
    if Bp != B:
        feat = jnp.pad(feat, ((0, Bp - B), (0, 0)))
    emb = jnp.concatenate([feat[None], cap_emb], axis=0)  # (T, Bp, E)

    # Hoisted LSTM input projection for all timesteps: x_t @ W_ih + (b_ih+b_hh)
    gx = fused_matmul(emb.reshape(T * Bp, E), params["w_ih"], params["b_gates"])
    gx = gx.reshape(T, Bp, 4 * Hp)                         # already time-major

    # Sequential LSTM over time (zero initial hidden/cell state).
    h_seq = lstm_recurrence(gx, params["w_hh"], Hp)        # (T, Bp, Hp)

    # self.linear(lstm_out) -- one H-wide transpose back to batch-major.
    h_bm = h_seq.transpose(1, 0, 2)[:B].reshape(B * T, Hp)
    logits = fused_matmul(h_bm, params["lin_w"], params["lin_b"])
    return logits[:, :V].reshape(B, T, V)


if __name__ == "__main__":
    batch, seq_len = 2, 8
    embed_size, hidden_size, vocab_size = 32, 32, 128

    key = jax.random.PRNGKey(0)
    k_params, k_feat, k_cap = jax.random.split(key, 3)
    raw = init_decoder_params(k_params, embed_size, hidden_size, vocab_size)
    params = prepare_decoder_params(raw, embed_size, hidden_size, vocab_size)
    features = jax.random.normal(k_feat, (batch, embed_size), jnp.float32)
    captions = jax.random.randint(k_cap, (batch, seq_len), 0, vocab_size, jnp.int32)

    outputs = decoder_rnn_forward(params, features, captions)
    outputs = jax.block_until_ready(outputs)

    assert outputs.shape == (batch, seq_len, vocab_size), outputs.shape
    assert bool(jnp.all(jnp.isfinite(outputs)))
    print("KERNEL_OK")
</pallas_src>

<mosaic_0001>
module attributes {stable_mosaic.version = 11 : i64} {
  func.func @_embed_gather_kernel(%arg0: i32, %arg1: memref<56xi32, #tpu.memory_space<smem>>, %arg2: memref<1x1x32xf32, #tpu.memory_space<vmem>>, %arg3: memref<1x1x32xf32, #tpu.memory_space<vmem>>) attributes {dimension_semantics = [#tpu.dimension_semantics<arbitrary>], iteration_bounds = array<i64: 56>, scalar_prefetch = 1 : i64, scratch_operands = 0 : i64, tpu.core_type = #tpu.core_type<tc>, window_params = [{transform_indices = @transform_0, window_bounds = array<i64: 1, 1, 32>}, {transform_indices = @transform_1, window_bounds = array<i64: 1, 1, 32>}]} {
    %c0 = arith.constant 0 : index
    %c0_0 = arith.constant 0 : index
    %c0_1 = arith.constant 0 : index
    %0 = vector.load %arg2[%c0, %c0_0, %c0_1] : memref<1x1x32xf32, #tpu.memory_space<vmem>>, vector<1x1x32xf32>
    %c0_2 = arith.constant 0 : index
    %c0_3 = arith.constant 0 : index
    %c0_4 = arith.constant 0 : index
    %1 = vector.load %arg3[%c0_2, %c0_3, %c0_4] : memref<1x1x32xf32, #tpu.memory_space<vmem>>, vector<1x1x32xf32>
    tpu.vector_store %arg3[%c0_2, %c0_3, %c0_4], %0 {strides = array<i32>} : memref<1x1x32xf32, #tpu.memory_space<vmem>>, vector<1x1x32xf32>,
    return
  }
  func.func @transform_0(%arg0: i32, %arg1: memref<56xi32, #tpu.memory_space<smem>>) -> (i32, i32, i32) {
    %0 = arith.index_cast %arg0 : i32 to index
    %1 = memref.load %arg1[%0] : memref<56xi32, #tpu.memory_space<smem>>
    %c0_i32 = arith.constant 0 : i32
    %c0_i32_0 = arith.constant 0 : i32
    %c0_i32_1 = arith.constant 0 : i32
    return %1, %c0_i32, %c0_i32_0 : i32, i32, i32
  }
  func.func @transform_1(%arg0: i32, %arg1: memref<56xi32, #tpu.memory_space<smem>>) -> (i32, i32, i32) {
    %c0_i32 = arith.constant 0 : i32
    %c0_i32_0 = arith.constant 0 : i32
    %c0_i32_1 = arith.constant 0 : i32
    return %arg0, %c0_i32, %c0_i32_0 : i32, i32, i32
  }
}

</mosaic_0001>

<bundles_post_ra>
// kernel: tpu_custom_call.1
= control target key start
LH: loop header
LB: loop body
LE: loop exit
PB: predicated region body
PF: predicated region fallthrough
CT: control target
= control target key end

     0   :  { %s231_s0 = inlined_call_operand.vmem [shape: s32[56], index: 0, kind: input, shape index: {}]   ;;  %s232_s1 = inlined_call_operand.vmem [shape: f32[128,1,32], index: 1, kind: input, shape index: {}]   ;;  %s233_s2 = inlined_call_operand.vmem [shape: f32[56,1,32], index: 2, kind: output, shape index: {}]  }
   0x1   :  { %s7_s11 = sshll.u32 %s231_s0, 4  ;;  %s8_s11 = int_to_ptr.vmem [resolvable:$true] %s7_s11 }
   0x2   :  { %s184_s12 = scalar_lea.vmem %s8_s11, 16  ;;  %p189_p1 = scmp.lt.s32.totalorder %s8_s11, %s8_s11 }
   0x3   :  { %p185_p0 = scmp.ne.s32.totalorder %s8_s11, %s184_s12  ;;  %p190_p2 = scmp.lt.s32.totalorder %s184_s12, %s184_s12 }
   0x5   :  { %p191_p3 = por %p190_p2, %p189_p1 }
   0x7   :  { %p192_p4 = pnand %p191_p3, %p185_p0 }
   0x9   :  { %195 = shalt.err (!%p192_p4)  }
   0xa   :  { %s206_s13 = smov [#allocation3]  }
   0xb   :  { %10 = dma.vmem_to_smem %s8_s11, 16, %s206_s13, [#allocation2] }
   0xc   :  { %200 = dma.done.wait [#allocation2], 16 }
   0xd   :  { %201 = vsyncadd [#allocation2], 4294967280 }
   0xe   :  { %12 = sfence }
   0xf   :  { %s202_s14 = smov 0  }
  0x10 LB: > { %s168_s15 = sadd.s32 4294967295, %s204_s14   ;;  %p172_p5 = scmp.ge.s32.totalorder %s204_s14, 1  ;;  %s204_s14 = sphi %s202_s14, %s18_s14  }
  0x11   : > { %p96_p6 = scmp.lt.s32.totalorder %s204_s14, 57 }
  0x13   : > { %p97_p7 = pnand %p172_p5, %p96_p6 }
  0x14   : > { %s113_s0 = sld [smem:[#allocation3 + %s168_s15]] (!%p97_p7)  ;;  %p118_p8 = scmp.lt.s32.totalorder (!%p97_p7), %s168_s15, 55  ;;  %vm122_vm0 = vcmask (!%p97_p7), 253952  }
  0x15   : > { %100 = sbr.rel (%p97_p7) target bundleno = 32 (0x20), region = 24 }
  0x1a   : > { %p114_p9 = scmp.lt.s32.totalorder (!%p97_p7), %s113_s0, 127 }
  0x1c   : > { %s235_s15 = smov (!%p118_p8, %s168_s15), 55  ;;  %s237_s0 = smov (!%p114_p9, %s113_s0), 127 }
  0x1d   : > { %s120_s18 = scalar_lea.vmem %s233_s2, %s235_s15  ;;  %s116_s21 = scalar_lea.vmem %s232_s1, %s237_s0 }
  0x1e   : > { %v121_v0 = vld [vmem:[%s116_s21] sm:$0x1] }
  0x1f   : > { %123 = vst.msk [vmem:[%s120_s18] sm:$0x1] %vm122_vm0, %v121_v0 }
  0x20 PF: > { %s18_s14 = sadd.s32 1, %s204_s14  }
  0x21   : > { %p15_p10 = scmp.ge.s32.totalorder %s18_s14, 58  }
  0x23   :  { %17 = sbr.rel (!%p15_p10) target bundleno = 16 (0x10), region = 54 }

</bundles_post_ra>
